<compile_context>
chip_gen: v6e
topology: v6e:2x2x1
jax: 0.10.0
libtpu: 0.0.40
codegen_flags: <defaults>
</compile_context>

<pallas_src>
import jax
import jax.numpy as jnp
from jax.experimental import pallas as pl
from jax.experimental.pallas import tpu as pltpu

SMEM = pltpu.MemorySpace.SMEM
_VMEM_LIMIT = 32 * 1024 * 1024


# --------------------------------------------------------------------------
# Kernel 1: fused conv1 (1x1 + bn1 + relu) and identity-downsample (1x1 + bn)
#   x2d: (M, Cin)  tiled over M;  both outputs computed from the same x tile.
# --------------------------------------------------------------------------
def _conv1_dual_kernel(x_ref, w1_ref, s1_ref, b1_ref, wd_ref, sd_ref, bd_ref,
                       o1_ref, od_ref):
    x = x_ref[...].astype(jnp.bfloat16)
    y1 = jnp.dot(x, w1_ref[...], preferred_element_type=jnp.float32)
    y1 = jnp.maximum(y1 * s1_ref[...] + b1_ref[...], 0.0)
    o1_ref[...] = y1.astype(o1_ref.dtype)
    yd = jnp.dot(x, wd_ref[...], preferred_element_type=jnp.float32)
    od_ref[...] = (yd * sd_ref[...] + bd_ref[...]).astype(od_ref.dtype)


def conv1_and_downsample(x2d, w1, s1, b1, wd, sd, bd, *, tm=512):
    m, cin = x2d.shape
    cout = w1.shape[1]
    ce = wd.shape[1]
    tm = m if m <= tm else tm          # full block for small M; 512-row tiles otherwise
    grid = (pl.cdiv(m, tm),)
    return pl.pallas_call(
        _conv1_dual_kernel,
        grid=grid,
        in_specs=[
            pl.BlockSpec((tm, cin), lambda i: (i, 0)),
            pl.BlockSpec((cin, cout), lambda i: (0, 0)),
            pl.BlockSpec((1, cout), lambda i: (0, 0)),
            pl.BlockSpec((1, cout), lambda i: (0, 0)),
            pl.BlockSpec((cin, ce), lambda i: (0, 0)),
            pl.BlockSpec((1, ce), lambda i: (0, 0)),
            pl.BlockSpec((1, ce), lambda i: (0, 0)),
        ],
        out_specs=(pl.BlockSpec((tm, cout), lambda i: (i, 0)),
                   pl.BlockSpec((tm, ce), lambda i: (i, 0))),
        out_shape=(jax.ShapeDtypeStruct((m, cout), jnp.bfloat16),
                   jax.ShapeDtypeStruct((m, ce), jnp.float32)),
        compiler_params=pltpu.CompilerParams(
            dimension_semantics=("parallel",),
            vmem_limit_bytes=_VMEM_LIMIT),
    )(x2d, w1, s1, b1, wd, sd, bd)


# --------------------------------------------------------------------------
# Kernel 2: 3x3 conv (padding=1) + folded BatchNorm + ReLU, gridded over batch.
#   Zero padding is written into a VMEM scratch inside the kernel (no jnp.pad in HBM);
#   the 9 shifted patches feed bf16 MXU dots accumulated in a local f32 value.
# --------------------------------------------------------------------------
def _conv3x3_bn_relu_kernel(x_ref, w_ref, s_ref, b_ref, o_ref, xpad_ref):
    _, h, w, c = x_ref.shape
    xpad_ref[...] = jnp.zeros_like(xpad_ref)
    xpad_ref[1:h + 1, 1:w + 1, :] = x_ref[0].astype(xpad_ref.dtype)
    acc = jnp.zeros((h * w, c), jnp.float32)
    for dy in range(3):
        for dx in range(3):
            patch = xpad_ref[dy:dy + h, dx:dx + w, :].reshape(h * w, c)
            acc = acc + jnp.dot(patch, w_ref[dy, dx],
                                preferred_element_type=jnp.float32)
    y = jnp.maximum(acc * s_ref[...] + b_ref[...], 0.0)
    o_ref[0] = y.reshape(h, w, c).astype(o_ref.dtype)


def conv3x3_bn_relu(x, w, scale, bias):
    # TODO(synk): for large H/W, additionally tile spatially (halo rows) so each block
    # stays within VMEM and the grid has enough steps to pipeline.
    n, h, wdim, c = x.shape
    return pl.pallas_call(
        _conv3x3_bn_relu_kernel,
        grid=(n,),
        in_specs=[
            pl.BlockSpec((1, h, wdim, c), lambda i: (i, 0, 0, 0)),
            pl.BlockSpec((3, 3, c, c), lambda i: (0, 0, 0, 0)),
            pl.BlockSpec((1, c), lambda i: (0, 0)),
            pl.BlockSpec((1, c), lambda i: (0, 0)),
        ],
        out_specs=pl.BlockSpec((1, h, wdim, c), lambda i: (i, 0, 0, 0)),
        out_shape=jax.ShapeDtypeStruct((n, h, wdim, c), jnp.bfloat16),
        scratch_shapes=[pltpu.VMEM((h + 2, wdim + 2, c), jnp.bfloat16)],
        compiler_params=pltpu.CompilerParams(
            dimension_semantics=("parallel",),
            vmem_limit_bytes=_VMEM_LIMIT),
    )(x, w, scale, bias)


# --------------------------------------------------------------------------
# Kernel 3: fused tail, gridded over batch.
#   conv3 (1x1) + bn3 -> CBAM channel attention -> CBAM spatial attention
#   -> residual add (identity path) -> ReLU.
#   Spatial 7x7 conv (2->1, pad 3) is done as 14 banded matmuls:
#     column taps are folded into precomputed (W, W) band matrices, row padding is a
#     small zeroed VMEM scratch.
# --------------------------------------------------------------------------
def _tail_kernel(x2_ref, idn_ref, w3_ref, s3_ref, b3_ref,
                 caw1_ref, cab1_ref, caw2_ref, cab2_ref,
                 band_ref, sab_ref, o_ref, prow_ref):
    _, h, w, cmid = x2_ref.shape
    ce = o_ref.shape[3]

    # ---- conv3 (1x1) + bn3 ----
    x2 = x2_ref[0].reshape(h * w, cmid)
    y = jnp.dot(x2, w3_ref[...], preferred_element_type=jnp.float32)
    y = y * s3_ref[...] + b3_ref[...]                       # (H*W, Ce) f32

    # ---- CBAM channel attention (avg + max pool over spatial, shared MLP) ----
    avg = jnp.mean(y, axis=0, keepdims=True)                # (1, Ce)
    mx = jnp.max(y, axis=0, keepdims=True)                  # (1, Ce)

    def shared_mlp(v):
        hdn = jnp.maximum(
            jnp.dot(v, caw1_ref[...], preferred_element_type=jnp.float32)
            + cab1_ref[...], 0.0)
        return (jnp.dot(hdn, caw2_ref[...], preferred_element_type=jnp.float32)
                + cab2_ref[...])

    gate_c = jax.nn.sigmoid(shared_mlp(avg) + shared_mlp(mx))   # (1, Ce)
    y = y * gate_c

    # ---- CBAM spatial attention ----
    y3 = y.reshape(h, w, ce)
    pmax = jnp.max(y3, axis=2)                              # (H, W)  ChannelPool max
    pmean = jnp.mean(y3, axis=2)                            # (H, W)  ChannelPool mean
    # zero-pad rows only (column padding is already inside the band matrices)
    prow_ref[...] = jnp.zeros_like(prow_ref)
    prow_ref[0, 3:3 + h, :] = pmax
    prow_ref[1, 3:3 + h, :] = pmean
    sconv = jnp.zeros((h, w), jnp.float32)
    for dy in range(7):
        sconv = sconv + jnp.dot(prow_ref[0, dy:dy + h, :], band_ref[0, dy],
                                preferred_element_type=jnp.float32)
        sconv = sconv + jnp.dot(prow_ref[1, dy:dy + h, :], band_ref[1, dy],
                                preferred_element_type=jnp.float32)
    gate_s = jax.nn.sigmoid(sconv + sab_ref[0])             # (H, W)

    # ---- scale, residual add, final ReLU ----
    out = jnp.maximum(y3 * gate_s[:, :, None] + idn_ref[0], 0.0)
    o_ref[0] = out.astype(o_ref.dtype)


def fused_tail(x2, idn, w3, s3, b3, caw1, cab1, caw2, cab2, band, sab):
    n, h, w, cmid = x2.shape
    ce = w3.shape[1]
    cr = caw1.shape[1]
    return pl.pallas_call(
        _tail_kernel,
        grid=(n,),
        in_specs=[
            pl.BlockSpec((1, h, w, cmid), lambda i: (i, 0, 0, 0)),
            pl.BlockSpec((1, h, w, ce), lambda i: (i, 0, 0, 0)),
            pl.BlockSpec((cmid, ce), lambda i: (0, 0)),
            pl.BlockSpec((1, ce), lambda i: (0, 0)),
            pl.BlockSpec((1, ce), lambda i: (0, 0)),
            pl.BlockSpec((ce, cr), lambda i: (0, 0)),
            pl.BlockSpec((1, cr), lambda i: (0, 0)),
            pl.BlockSpec((cr, ce), lambda i: (0, 0)),
            pl.BlockSpec((1, ce), lambda i: (0, 0)),
            pl.BlockSpec((2, 7, w, w), lambda i: (0, 0, 0, 0)),
            pl.BlockSpec(memory_space=SMEM),
        ],
        out_specs=pl.BlockSpec((1, h, w, ce), lambda i: (i, 0, 0, 0)),
        out_shape=jax.ShapeDtypeStruct((n, h, w, ce), jnp.float32),
        scratch_shapes=[pltpu.VMEM((2, h + 6, w), jnp.float32)],
        compiler_params=pltpu.CompilerParams(
            dimension_semantics=("parallel",),
            vmem_limit_bytes=_VMEM_LIMIT),
    )(x2, idn, w3, s3, b3, caw1, cab1, caw2, cab2, band, sab)


# --------------------------------------------------------------------------
# Host-side helpers (run in XLA, outside the kernels)
# --------------------------------------------------------------------------
def _sa_band(w_eff, wdim):
    """Banded (W, W) matrices for the 7-tap column convolution with zero padding 3.

    band[cp, dy][c, j] = w_eff[dy, c - j + 3, cp] when the tap is valid, else 0, so that
    pooled_rows[dy:dy+H, :] @ band[cp, dy] implements the dx sweep of the 7x7 conv.
    """
    c_idx = jnp.arange(wdim)[:, None]
    j_idx = jnp.arange(wdim)[None, :]
    dx = c_idx - j_idx + 3
    valid = (dx >= 0) & (dx <= 6)
    dx_c = jnp.clip(dx, 0, 6)
    w_cp = jnp.transpose(w_eff, (2, 0, 1))          # (2, 7, 7) [cp, dy, dx]
    band = w_cp[:, :, dx_c]                         # (2, 7, W, W)
    return jnp.where(valid[None, None], band, 0.0).astype(jnp.float32)


def _fold_bn(gamma, beta, mean, var, eps=1e-5):
    scale = gamma / jnp.sqrt(var + eps)
    bias = beta - mean * scale
    return scale[None, :], bias[None, :]


def init_params(key, cin, cout, expansion, reduction_ratio=16):
    ce = cout * expansion
    cr = max(1, ce // reduction_ratio)
    ks = jax.random.split(key, 14)

    def rnd(k, shape, s=0.1):
        return s * jax.random.normal(k, shape, jnp.float32)

    def bn(k, c):
        kg, kb = jax.random.split(k)
        gamma = 1.0 + 0.1 * jax.random.normal(kg, (c,), jnp.float32)
        beta = 0.1 * jax.random.normal(kb, (c,), jnp.float32)
        return _fold_bn(gamma, beta, jnp.zeros((c,), jnp.float32),
                        jnp.ones((c,), jnp.float32))

    p = {}
    p["w1"] = rnd(ks[0], (cin, cout)).astype(jnp.bfloat16)          # conv1 1x1
    p["w2"] = rnd(ks[1], (3, 3, cout, cout)).astype(jnp.bfloat16)   # conv2 3x3
    p["w3"] = rnd(ks[2], (cout, ce)).astype(jnp.bfloat16)           # conv3 1x1
    p["wd"] = rnd(ks[3], (cin, ce)).astype(jnp.bfloat16)            # identity 1x1
    p["bn1_scale"], p["bn1_bias"] = bn(ks[4], cout)
    p["bn2_scale"], p["bn2_bias"] = bn(ks[5], cout)
    p["bn3_scale"], p["bn3_bias"] = bn(ks[6], ce)
    p["bnd_scale"], p["bnd_bias"] = bn(ks[7], ce)
    # channel attention shared MLP
    p["ca_w1"] = rnd(ks[8], (ce, cr))
    p["ca_b1"] = rnd(ks[9], (1, cr), 0.01)
    p["ca_w2"] = rnd(ks[10], (cr, ce))
    p["ca_b2"] = rnd(ks[11], (1, ce), 0.01)
    # spatial attention: 7x7 conv (2 -> 1, no bias) + BatchNorm(1) folded
    sa_w = rnd(ks[12], (7, 7, 2))                 # [dy, dx, {max, mean}]
    sa_scale, sa_bias = bn(ks[13], 1)
    p["sa_w_eff"] = sa_w * sa_scale[0, 0]         # BN scale folded into the conv weight
    p["sa_b"] = sa_bias.reshape(-1)               # (1,) scalar BN bias, for SMEM
    return p


# --------------------------------------------------------------------------
# BottleNeck forward (NCHW in / NCHW out, matching the PyTorch module)
# --------------------------------------------------------------------------
def bottleneck_forward(x_nchw, p, *, stride=1):
    n, cin, h, w = x_nchw.shape
    xh = jnp.transpose(x_nchw, (0, 2, 3, 1))          # NHWC
    xs = xh[:, ::stride, ::stride, :]                 # 1x1 conv w/ stride == subsample
    hs, ws = xs.shape[1], xs.shape[2]
    cout = p["w1"].shape[1]
    ce = p["w3"].shape[1]
    m = n * hs * ws

    # conv1 + bn1 + relu  AND  identity downsample + bn  (one fused kernel)
    out1, idn = conv1_and_downsample(
        xs.reshape(m, cin), p["w1"], p["bn1_scale"], p["bn1_bias"],
        p["wd"], p["bnd_scale"], p["bnd_bias"])
    out1 = out1.reshape(n, hs, ws, cout)

    # conv2 (3x3, pad 1) + bn2 + relu
    out2 = conv3x3_bn_relu(out1, p["w2"], p["bn2_scale"], p["bn2_bias"])

    # conv3 + bn3 + CBAM (channel + spatial) + residual + relu (one fused kernel)
    band = _sa_band(p["sa_w_eff"], ws)
    out = fused_tail(out2, idn.reshape(n, hs, ws, ce),
                     p["w3"], p["bn3_scale"], p["bn3_bias"],
                     p["ca_w1"], p["ca_b1"], p["ca_w2"], p["ca_b2"],
                     band, p["sa_b"])
    return jnp.transpose(out, (0, 3, 1, 2))           # back to NCHW
    # TODO(synk): training-mode BatchNorm (batch statistics) not reproduced; kernels
    # implement the standard inference-mode affine form, and the projection shortcut
    # (conv+bn identity path) is always applied, matching the provided configuration.


if __name__ == "__main__":
    key = jax.random.PRNGKey(0)
    kx, kp = jax.random.split(key)

    N, Cin, H, W = 2, 16, 8, 8
    out_channels, expansion = 16, 4            # -> 64 output channels, reduction 64//16=4

    x = jax.random.normal(kx, (N, Cin, H, W), jnp.float32)
    params = init_params(kp, Cin, out_channels, expansion)

    y = bottleneck_forward(x, params, stride=1)
    y = jax.block_until_ready(y)

    assert y.shape == (N, out_channels * expansion, H, W), y.shape
    assert bool(jnp.all(jnp.isfinite(y)))
    assert bool(jnp.all(y >= 0.0))             # final ReLU
    print("KERNEL_OK")
</pallas_src>

<mosaic_0001>
module attributes {stable_mosaic.version = 11 : i64} {
  func.func @_conv1_dual_kernel(%arg0: i32, %arg1: memref<128x16xf32, #tpu.memory_space<vmem>>, %arg2: memref<16x16xbf16, #tpu.memory_space<vmem>>, %arg3: memref<1x16xf32, #tpu.memory_space<vmem>>, %arg4: memref<1x16xf32, #tpu.memory_space<vmem>>, %arg5: memref<16x64xbf16, #tpu.memory_space<vmem>>, %arg6: memref<1x64xf32, #tpu.memory_space<vmem>>, %arg7: memref<1x64xf32, #tpu.memory_space<vmem>>, %arg8: memref<128x16xbf16, #tpu.memory_space<vmem>>, %arg9: memref<128x64xf32, #tpu.memory_space<vmem>>) attributes {dimension_semantics = [#tpu.dimension_semantics<parallel>], iteration_bounds = array<i64: 1>, scalar_prefetch = 0 : i64, scratch_operands = 0 : i64, tpu.core_type = #tpu.core_type<tc>, window_params = [{transform_indices = @transform_0, window_bounds = array<i64: 128, 16>}, {pipeline_mode = #tpu.pipeline_mode<synchronous>, transform_indices = @transform_1, window_bounds = array<i64: 16, 16>}, {pipeline_mode = #tpu.pipeline_mode<synchronous>, transform_indices = @transform_2, window_bounds = array<i64: 1, 16>}, {pipeline_mode = #tpu.pipeline_mode<synchronous>, transform_indices = @transform_3, window_bounds = array<i64: 1, 16>}, {pipeline_mode = #tpu.pipeline_mode<synchronous>, transform_indices = @transform_4, window_bounds = array<i64: 16, 64>}, {pipeline_mode = #tpu.pipeline_mode<synchronous>, transform_indices = @transform_5, window_bounds = array<i64: 1, 64>}, {pipeline_mode = #tpu.pipeline_mode<synchronous>, transform_indices = @transform_6, window_bounds = array<i64: 1, 64>}, {transform_indices = @transform_7, window_bounds = array<i64: 128, 16>}, {transform_indices = @transform_8, window_bounds = array<i64: 128, 64>}]} {
    %c0 = arith.constant 0 : index
    %c0_0 = arith.constant 0 : index
    %0 = vector.load %arg1[%c0, %c0_0] : memref<128x16xf32, #tpu.memory_space<vmem>>, vector<128x16xf32>
    %1 = arith.truncf %0 : vector<128x16xf32> to vector<128x16xbf16>
    %c0_1 = arith.constant 0 : index
    %c0_2 = arith.constant 0 : index
    %2 = vector.load %arg2[%c0_1, %c0_2] : memref<16x16xbf16, #tpu.memory_space<vmem>>, vector<16x16xbf16>
    %cst = arith.constant dense<0.000000e+00> : vector<128x16xf32>
    %3 = tpu.matmul %1, %2, %cst {dimension_numbers = #tpu.dot_dimension_numbers<[1], [0], [0], [1], [0, 0, 1, 1], [], []>} : vector<128x16xbf16>, vector<16x16xbf16>, vector<128x16xf32> -> vector<128x16xf32>
    %c0_3 = arith.constant 0 : index
    %c0_4 = arith.constant 0 : index
    %4 = vector.load %arg3[%c0_3, %c0_4] : memref<1x16xf32, #tpu.memory_space<vmem>>, vector<1x16xf32>
    %5 = vector.broadcast %4 : vector<1x16xf32> to vector<128x16xf32>
    %6 = arith.mulf %3, %5 : vector<128x16xf32>
    %c0_5 = arith.constant 0 : index
    %c0_6 = arith.constant 0 : index
    %7 = vector.load %arg4[%c0_5, %c0_6] : memref<1x16xf32, #tpu.memory_space<vmem>>, vector<1x16xf32>
    %8 = vector.broadcast %7 : vector<1x16xf32> to vector<128x16xf32>
    %9 = arith.addf %6, %8 : vector<128x16xf32>
    %cst_7 = arith.constant 0.000000e+00 : f32
    %10 = vector.broadcast %cst_7 : f32 to vector<128x16xf32>
    %11 = arith.maximumf %9, %10 : vector<128x16xf32>
    %12 = arith.truncf %11 : vector<128x16xf32> to vector<128x16xbf16>
    %c0_8 = arith.constant 0 : index
    %c0_9 = arith.constant 0 : index
    %13 = vector.load %arg8[%c0_8, %c0_9] : memref<128x16xbf16, #tpu.memory_space<vmem>>, vector<128x16xbf16>
    tpu.vector_store %arg8[%c0_8, %c0_9], %12 {strides = array<i32>} : memref<128x16xbf16, #tpu.memory_space<vmem>>, vector<128x16xbf16>,
    %c0_10 = arith.constant 0 : index
    %c0_11 = arith.constant 0 : index
    %14 = vector.load %arg5[%c0_10, %c0_11] : memref<16x64xbf16, #tpu.memory_space<vmem>>, vector<16x64xbf16>
    %cst_12 = arith.constant dense<0.000000e+00> : vector<128x64xf32>
    %15 = tpu.matmul %1, %14, %cst_12 {dimension_numbers = #tpu.dot_dimension_numbers<[1], [0], [0], [1], [0, 0, 1, 1], [], []>} : vector<128x16xbf16>, vector<16x64xbf16>, vector<128x64xf32> -> vector<128x64xf32>
    %c0_13 = arith.constant 0 : index
    %c0_14 = arith.constant 0 : index
    %16 = vector.load %arg6[%c0_13, %c0_14] : memref<1x64xf32, #tpu.memory_space<vmem>>, vector<1x64xf32>
    %17 = vector.broadcast %16 : vector<1x64xf32> to vector<128x64xf32>
    %18 = arith.mulf %15, %17 : vector<128x64xf32>
    %c0_15 = arith.constant 0 : index
    %c0_16 = arith.constant 0 : index
    %19 = vector.load %arg7[%c0_15, %c0_16] : memref<1x64xf32, #tpu.memory_space<vmem>>, vector<1x64xf32>
    %20 = vector.broadcast %19 : vector<1x64xf32> to vector<128x64xf32>
    %21 = arith.addf %18, %20 : vector<128x64xf32>
    %c0_17 = arith.constant 0 : index
    %c0_18 = arith.constant 0 : index
    %22 = vector.load %arg9[%c0_17, %c0_18] : memref<128x64xf32, #tpu.memory_space<vmem>>, vector<128x64xf32>
    tpu.vector_store %arg9[%c0_17, %c0_18], %21 {strides = array<i32>} : memref<128x64xf32, #tpu.memory_space<vmem>>, vector<128x64xf32>,
    return
  }
  func.func @transform_0(%arg0: i32) -> (i32, i32) {
    %c0_i32 = arith.constant 0 : i32
    %c0_i32_0 = arith.constant 0 : i32
    return %arg0, %c0_i32 : i32, i32
  }
  func.func @transform_1(%arg0: i32) -> (i32, i32) {
    %c0_i32 = arith.constant 0 : i32
    %c0_i32_0 = arith.constant 0 : i32
    %c0_i32_1 = arith.constant 0 : i32
    return %c0_i32, %c0_i32_0 : i32, i32
  }
  func.func @transform_2(%arg0: i32) -> (i32, i32) {
    %c0_i32 = arith.constant 0 : i32
    %c0_i32_0 = arith.constant 0 : i32
    %c0_i32_1 = arith.constant 0 : i32
    return %c0_i32, %c0_i32_0 : i32, i32
  }
  func.func @transform_3(%arg0: i32) -> (i32, i32) {
    %c0_i32 = arith.constant 0 : i32
    %c0_i32_0 = arith.constant 0 : i32
    %c0_i32_1 = arith.constant 0 : i32
    return %c0_i32, %c0_i32_0 : i32, i32
  }
  func.func @transform_4(%arg0: i32) -> (i32, i32) {
    %c0_i32 = arith.constant 0 : i32
    %c0_i32_0 = arith.constant 0 : i32
    %c0_i32_1 = arith.constant 0 : i32
    return %c0_i32, %c0_i32_0 : i32, i32
  }
  func.func @transform_5(%arg0: i32) -> (i32, i32) {
    %c0_i32 = arith.constant 0 : i32
    %c0_i32_0 = arith.constant 0 : i32
    %c0_i32_1 = arith.constant 0 : i32
    return %c0_i32, %c0_i32_0 : i32, i32
  }
  func.func @transform_6(%arg0: i32) -> (i32, i32) {
    %c0_i32 = arith.constant 0 : i32
    %c0_i32_0 = arith.constant 0 : i32
    %c0_i32_1 = arith.constant 0 : i32
    return %c0_i32, %c0_i32_0 : i32, i32
  }
  func.func @transform_7(%arg0: i32) -> (i32, i32) {
    %c0_i32 = arith.constant 0 : i32
    %c0_i32_0 = arith.constant 0 : i32
    return %arg0, %c0_i32 : i32, i32
  }
  func.func @transform_8(%arg0: i32) -> (i32, i32) {
    %c0_i32 = arith.constant 0 : i32
    %c0_i32_0 = arith.constant 0 : i32
    return %arg0, %c0_i32 : i32, i32
  }
}

</mosaic_0001>

<bundles_post_ra>
// kernel: tpu_custom_call.1
= control target key start
LH: loop header
LB: loop body
LE: loop exit
PB: predicated region body
PF: predicated region fallthrough
CT: control target
= control target key end

     0   :  { %vm61_vm0 = vcmask 130048   ;;  %vm477_vm1 = vcmask 523264   ;;  %vm309_vm2 = vcmask 125952   ;;  %s939_s1 = inlined_call_operand.vmem [shape: bf16[16,16], index: 1, kind: input, shape index: {}]   ;;  %s940_s4 = inlined_call_operand.vmem [shape: bf16[16,64], index: 4, kind: input, shape index: {}]   ;;  %s941_s0 = inlined_call_operand.vmem [shape: f32[128,16], index: 0, kind: input, shape index: {}]   ;;  %s942_s2 = inlined_call_operand.vmem [shape: f32[1,16], index: 2, kind: input, shape index: {}]   ;;  %s943_s5 = inlined_call_operand.vmem [shape: f32[1,64], index: 5, kind: input, shape index: {}]   ;;  %s944_s3 = inlined_call_operand.vmem [shape: f32[1,16], index: 3, kind: input, shape index: {}]   ;;  %s945_s6 = inlined_call_operand.vmem [shape: f32[1,64], index: 6, kind: input, shape index: {}]   ;;  %s946_s8 = inlined_call_operand.vmem [shape: f32[128,64], index: 8, kind: output, shape index: {1}]   ;;  %s947_s7 = inlined_call_operand.vmem [shape: bf16[128,16], index: 7, kind: output, shape index: {0}]  }
   0x1   :  { %v610_v0 = vld [vmem:[%s939_s1] sm:$0xff]   ;;  %v30_v3 = vld [vmem:[%s941_s0 + $0x8] sm:$0xff]  ;;  %v31_v4 = vld [vmem:[%s941_s0 + $0x10] sm:$0xff] }
   0x2   :  { %v611_v1 = vld [vmem:[%s940_s4] sm:$0xff]   ;;  %574 = vmatprep.subr.bf16.mxu0 %v610_v0  ;;  %v32_v6 = vld [vmem:[%s941_s0 + $0x18] sm:$0xff]  ;;  %v34_v8 = vld [vmem:[%s941_s0 + $0x28] sm:$0xff] }
   0x3   :  { %v29_v2 = vld [vmem:[%s941_s0] sm:$0xff]  ;;  %592 = vmatprep.subr.bf16.mxu1 %v611_v1  ;;  %575 = vmatpush3.bf16.msra.mxu0 %v610_v0  ;;  %v46_v9 = vpack.c.bf16 %v32_v6, %v31_v4  ;;  %v35_v11 = vld [vmem:[%s941_s0 + $0x30] sm:$0xff]  ;;  %v36_v12 = vld [vmem:[%s941_s0 + $0x38] sm:$0xff] }
   0x4   :  { %v45_v5 = vpack.c.bf16 %v30_v3, %v29_v2  ;;  %v33_v7 = vld [vmem:[%s941_s0 + $0x20] sm:$0xff]  ;;  %593 = vmatpush3.bf16.msra.mxu1 %v611_v1  ;;  %v38_v14 = vld [vmem:[%s941_s0 + $0x48] sm:$0xff]  ;;  %v48_v15 = vpack.c.bf16 %v36_v12, %v35_v11  ;;  %v39_v17 = vld [vmem:[%s941_s0 + $0x50] sm:$0xff] }
   0x5   :  { %v47_v10 = vpack.c.bf16 %v34_v8, %v33_v7  ;;  %v37_v13 = vld [vmem:[%s941_s0 + $0x40] sm:$0xff]  ;;  %v40_v18 = vld [vmem:[%s941_s0 + $0x58] sm:$0xff]  ;;  %v42_v20 = vld [vmem:[%s941_s0 + $0x68] sm:$0xff] }
   0x6   :  { %576 = vmatprep.mubr.msk.bf16.mxu0 %vm61_vm0, %v45_v5  ;;  %594 = vmatprep.mubr.msk.bf16.mxu1 %vm61_vm0, %v45_v5  ;;  %v49_v16 = vpack.c.bf16 %v38_v14, %v37_v13  ;;  %v41_v19 = vld [vmem:[%s941_s0 + $0x60] sm:$0xff]  ;;  %v50_v21 = vpack.c.bf16 %v40_v18, %v39_v17  ;;  %v43_v23 = vld [vmem:[%s941_s0 + $0x70] sm:$0xff]  ;;  %v44_v24 = vld [vmem:[%s941_s0 + $0x78] sm:$0xff] }
   0x7   :  { %577 = vmatmul.mubr.msk.bf16.vlgmr.msra.gmra.mxu0 %vm61_vm0, %v46_v9  ;;  %595 = vmatmul.mubr.msk.bf16.vlgmr.msra.gmra.mxu1 %vm61_vm0, %v46_v9  ;;  %v51_v22 = vpack.c.bf16 %v42_v20, %v41_v19  ;;  %v52_v25 = vpack.c.bf16 %v44_v24, %v43_v23  ;;  %v730_v26 = vld [vmem:[%s942_s2] ss:$0 sm:$0xff] }
   0x8   :  { %580 = vmatprep.mubr.msk.bf16.mxu0 %vm61_vm0, %v47_v10  ;;  %598 = vmatprep.mubr.msk.bf16.mxu1 %vm61_vm0, %v47_v10  ;;  %v735_v27 = vld [vmem:[%s943_s5] ss:$0 sm:$0xff] }
   0x9   :  { %v740_v29 = vld [vmem:[%s944_s3] ss:$0 sm:$0xff] }
   0xa   :  { %v746_v32 = vld [vmem:[%s945_s6] ss:$0 sm:$0xff] }
   0xf   :  { %581 = vmatmul.mubr.msk.bf16.gmra.mxu0 %vm61_vm0, %v48_v15  ;;  %599 = vmatmul.mubr.msk.bf16.gmra.mxu1 %vm61_vm0, %v48_v15 }
  0x10   :  { %584 = vmatprep.mubr.msk.bf16.mxu0 %vm61_vm0, %v49_v16  ;;  %602 = vmatprep.mubr.msk.bf16.mxu1 %vm61_vm0, %v49_v16 }
  0x17   :  { %585 = vmatmul.mubr.msk.bf16.gmra.mxu0 %vm61_vm0, %v50_v21  ;;  %603 = vmatmul.mubr.msk.bf16.gmra.mxu1 %vm61_vm0, %v50_v21 }
  0x18   :  { %588 = vmatprep.mubr.msk.bf16.mxu0 %vm61_vm0, %v51_v22  ;;  %606 = vmatprep.mubr.msk.bf16.mxu1 %vm61_vm0, %v51_v22 }
  0x1f   :  { %589 = vmatmul.mubr.msk.bf16.gmra.mxu0 %vm61_vm0, %v52_v25  ;;  %607 = vmatmul.mubr.msk.bf16.gmra.mxu1 %vm61_vm0, %v52_v25 }
  0xc7   :  { %v578_v28 = vpop.f32.mrf.mxu0  ;;  %v596_v31 = vpop.f32.mrf.mxu1 }
  0xc8   :  { %v192_v30 = vmul.f32 %v578_v28, %v730_v26  ;;  %v440_v33 = vmul.f32 %v596_v31, %v735_v27 }
  0xc9   :  { %v120_v34 = vpop.f32.mrf.mxu0  ;;  %v368_v37 = vpop.f32.mrf.mxu1 }
  0xca   :  { %v215_v35 = vadd.f32 %v740_v29, %v192_v30  ;;  %v190_v36 = vmul.f32 %v730_v26, %v120_v34  ;;  %v463_v38 = vadd.f32 %v746_v32, %v440_v33  ;;  %v438_v39 = vmul.f32 %v735_v27, %v368_v37 }
  0xcb   :  { %v579_v40 = vpop.f32.mrf.mxu0  ;;  %v597_v44 = vpop.f32.mrf.mxu1 }
  0xcc   :  { %v231_v41 = vmax.f32 %v215_v35, 0.0  ;;  %v213_v42 = vadd.f32 %v740_v29, %v190_v36  ;;  %v193_v43 = vmul.f32 %v579_v40, %v730_v26  ;;  %480 = vst.msk [vmem:[%s946_s8 + $0x10] sm:$0xff] %vm477_vm1, %v463_v38  ;;  %v461_v45 = vadd.f32 %v746_v32, %v438_v39 }
  0xcd   :  { %v441_v46 = vmul.f32 %v597_v44, %v735_v27  ;;  %v123_v47 = vpop.f32.mrf.mxu0  ;;  %v371_v52 = vpop.f32.mrf.mxu1 }
  0xce   :  { %v542_v48 = vpack.c.bf16 %v231_v41, %v231_v41  ;;  %v229_v49 = vmax.f32 %v213_v42, 0.0  ;;  %v216_v50 = vadd.f32 %v740_v29, %v193_v43  ;;  %v191_v51 = vmul.f32 %v730_v26, %v123_v47  ;;  %478 = vst.msk [vmem:[%s946_s8] sm:$0xff] %vm477_vm1, %v461_v45 }
  0xcf   :  { %v464_v53 = vadd.f32 %v746_v32, %v441_v46  ;;  %v439_v54 = vmul.f32 %v735_v27, %v371_v52  ;;  %v582_v55 = vpop.f32.mrf.mxu0  ;;  %v600_v60 = vpop.f32.mrf.mxu1 }
  0xd0   :  { %312 = vst.msk [vmem:[%s947_s7 + $0x8] sm:$0xf] %vm309_vm2, %v542_v48  ;;  %v540_v56 = vpack.c.bf16 %v229_v49, %v229_v49  ;;  %v232_v57 = vmax.f32 %v216_v50, 0.0  ;;  %v214_v58 = vadd.f32 %v740_v29, %v191_v51  ;;  %v196_v59 = vmul.f32 %v582_v55, %v730_v26 }
  0xd1   :  { %481 = vst.msk [vmem:[%s946_s8 + $0x18] sm:$0xff] %vm477_vm1, %v464_v53  ;;  %v462_v61 = vadd.f32 %v746_v32, %v439_v54  ;;  %v444_v62 = vmul.f32 %v600_v60, %v735_v27  ;;  %v136_v63 = vpop.f32.mrf.mxu0  ;;  %v384_v4 = vpop.f32.mrf.mxu1 }
  0xd2   :  { %310 = vst.msk [vmem:[%s947_s7] sm:$0xf] %vm309_vm2, %v540_v56  ;;  %v543_v0 = vpack.c.bf16 %v232_v57, %v232_v57  ;;  %v230_v1 = vmax.f32 %v214_v58, 0.0  ;;  %v219_v2 = vadd.f32 %v740_v29, %v196_v59  ;;  %v194_v3 = vmul.f32 %v730_v26, %v136_v63 }
  0xd3   :  { %479 = vst.msk [vmem:[%s946_s8 + $0x8] sm:$0xff] %vm477_vm1, %v462_v61  ;;  %v467_v5 = vadd.f32 %v746_v32, %v444_v62  ;;  %v442_v6 = vmul.f32 %v735_v27, %v384_v4  ;;  %v583_v7 = vpop.f32.mrf.mxu0  ;;  %v601_v12 = vpop.f32.mrf.mxu1 }
  0xd4   :  { %313 = vst.msk [vmem:[%s947_s7 + $0xc] sm:$0xf] %vm309_vm2, %v543_v0  ;;  %v541_v8 = vpack.c.bf16 %v230_v1, %v230_v1  ;;  %v235_v9 = vmax.f32 %v219_v2, 0.0  ;;  %v217_v10 = vadd.f32 %v740_v29, %v194_v3  ;;  %v197_v11 = vmul.f32 %v583_v7, %v730_v26 }
  0xd5   :  { %484 = vst.msk [vmem:[%s946_s8 + $0x30] sm:$0xff] %vm477_vm1, %v467_v5  ;;  %v465_v13 = vadd.f32 %v746_v32, %v442_v6  ;;  %v445_v14 = vmul.f32 %v601_v12, %v735_v27  ;;  %v139_v15 = vpop.f32.mrf.mxu0  ;;  %v387_v20 = vpop.f32.mrf.mxu1 }
  0xd6   :  { %311 = vst.msk [vmem:[%s947_s7 + $0x4] sm:$0xf] %vm309_vm2, %v541_v8  ;;  %v546_v16 = vpack.c.bf16 %v235_v9, %v235_v9  ;;  %v233_v17 = vmax.f32 %v217_v10, 0.0  ;;  %v220_v18 = vadd.f32 %v740_v29, %v197_v11  ;;  %v195_v19 = vmul.f32 %v730_v26, %v139_v15 }
  0xd7   :  { %482 = vst.msk [vmem:[%s946_s8 + $0x20] sm:$0xff] %vm477_vm1, %v465_v13  ;;  %v468_v21 = vadd.f32 %v746_v32, %v445_v14  ;;  %v443_v22 = vmul.f32 %v735_v27, %v387_v20  ;;  %v586_v23 = vpop.f32.mrf.mxu0  ;;  %v604_v31 = vpop.f32.mrf.mxu1 }
  0xd8   :  { %316 = vst.msk [vmem:[%s947_s7 + $0x18] sm:$0xf] %vm309_vm2, %v546_v16  ;;  %v544_v24 = vpack.c.bf16 %v233_v17, %v233_v17  ;;  %v236_v25 = vmax.f32 %v220_v18, 0.0  ;;  %v218_v28 = vadd.f32 %v740_v29, %v195_v19  ;;  %v200_v30 = vmul.f32 %v586_v23, %v730_v26 }
  0xd9   :  { %485 = vst.msk [vmem:[%s946_s8 + $0x38] sm:$0xff] %vm477_vm1, %v468_v21  ;;  %v466_v33 = vadd.f32 %v746_v32, %v443_v22  ;;  %v448_v34 = vmul.f32 %v604_v31, %v735_v27  ;;  %v152_v35 = vpop.f32.mrf.mxu0  ;;  %v400_v40 = vpop.f32.mrf.mxu1 }
  0xda   :  { %314 = vst.msk [vmem:[%s947_s7 + $0x10] sm:$0xf] %vm309_vm2, %v544_v24  ;;  %v547_v36 = vpack.c.bf16 %v236_v25, %v236_v25  ;;  %v234_v37 = vmax.f32 %v218_v28, 0.0  ;;  %v223_v38 = vadd.f32 %v740_v29, %v200_v30  ;;  %v198_v39 = vmul.f32 %v730_v26, %v152_v35 }
  0xdb   :  { %483 = vst.msk [vmem:[%s946_s8 + $0x28] sm:$0xff] %vm477_vm1, %v466_v33  ;;  %v471_v41 = vadd.f32 %v746_v32, %v448_v34  ;;  %v446_v42 = vmul.f32 %v735_v27, %v400_v40  ;;  %v587_v43 = vpop.f32.mrf.mxu0  ;;  %v605_v48 = vpop.f32.mrf.mxu1 }
  0xdc   :  { %317 = vst.msk [vmem:[%s947_s7 + $0x1c] sm:$0xf] %vm309_vm2, %v547_v36  ;;  %v545_v44 = vpack.c.bf16 %v234_v37, %v234_v37  ;;  %v239_v45 = vmax.f32 %v223_v38, 0.0  ;;  %v221_v46 = vadd.f32 %v740_v29, %v198_v39  ;;  %v201_v47 = vmul.f32 %v587_v43, %v730_v26 }
  0xdd   :  { %488 = vst.msk [vmem:[%s946_s8 + $0x50] sm:$0xff] %vm477_vm1, %v471_v41  ;;  %v469_v49 = vadd.f32 %v746_v32, %v446_v42  ;;  %v449_v50 = vmul.f32 %v605_v48, %v735_v27  ;;  %v155_v51 = vpop.f32.mrf.mxu0  ;;  %v403_v56 = vpop.f32.mrf.mxu1 }
  0xde   :  { %315 = vst.msk [vmem:[%s947_s7 + $0x14] sm:$0xf] %vm309_vm2, %v545_v44  ;;  %v550_v52 = vpack.c.bf16 %v239_v45, %v239_v45  ;;  %v237_v53 = vmax.f32 %v221_v46, 0.0  ;;  %v224_v54 = vadd.f32 %v740_v29, %v201_v47  ;;  %v199_v55 = vmul.f32 %v730_v26, %v155_v51 }
  0xdf   :  { %486 = vst.msk [vmem:[%s946_s8 + $0x40] sm:$0xff] %vm477_vm1, %v469_v49  ;;  %v472_v57 = vadd.f32 %v746_v32, %v449_v50  ;;  %v447_v58 = vmul.f32 %v735_v27, %v403_v56  ;;  %v590_v59 = vpop.f32.mrf.mxu0  ;;  %v608_v0 = vpop.f32.mrf.mxu1 }
  0xe0   :  { %320 = vst.msk [vmem:[%s947_s7 + $0x28] sm:$0xf] %vm309_vm2, %v550_v52  ;;  %v548_v60 = vpack.c.bf16 %v237_v53, %v237_v53  ;;  %v240_v61 = vmax.f32 %v224_v54, 0.0  ;;  %v222_v62 = vadd.f32 %v740_v29, %v199_v55  ;;  %v204_v63 = vmul.f32 %v590_v59, %v730_v26 }
  0xe1   :  { %489 = vst.msk [vmem:[%s946_s8 + $0x58] sm:$0xff] %vm477_vm1, %v472_v57  ;;  %v470_v1 = vadd.f32 %v746_v32, %v447_v58  ;;  %v452_v2 = vmul.f32 %v608_v0, %v735_v27  ;;  %v168_v3 = vpop.f32.mrf.mxu0  ;;  %v416_v8 = vpop.f32.mrf.mxu1 }
  0xe2   :  { %318 = vst.msk [vmem:[%s947_s7 + $0x20] sm:$0xf] %vm309_vm2, %v548_v60  ;;  %v551_v4 = vpack.c.bf16 %v240_v61, %v240_v61  ;;  %v238_v5 = vmax.f32 %v222_v62, 0.0  ;;  %v227_v6 = vadd.f32 %v740_v29, %v204_v63  ;;  %v202_v7 = vmul.f32 %v730_v26, %v168_v3 }
  0xe3   :  { %487 = vst.msk [vmem:[%s946_s8 + $0x48] sm:$0xff] %vm477_vm1, %v470_v1  ;;  %v475_v9 = vadd.f32 %v746_v32, %v452_v2  ;;  %v450_v10 = vmul.f32 %v735_v27, %v416_v8  ;;  %v591_v11 = vpop.f32.mrf.mxu0  ;;  %v609_v16 = vpop.f32.mrf.mxu1 }
  0xe4   :  { %321 = vst.msk [vmem:[%s947_s7 + $0x2c] sm:$0xf] %vm309_vm2, %v551_v4  ;;  %v549_v12 = vpack.c.bf16 %v238_v5, %v238_v5  ;;  %v243_v13 = vmax.f32 %v227_v6, 0.0  ;;  %v225_v14 = vadd.f32 %v740_v29, %v202_v7  ;;  %v205_v15 = vmul.f32 %v591_v11, %v730_v26 }
  0xe5   :  { %492 = vst.msk [vmem:[%s946_s8 + $0x70] sm:$0xff] %vm477_vm1, %v475_v9  ;;  %v473_v17 = vadd.f32 %v746_v32, %v450_v10  ;;  %v453_v18 = vmul.f32 %v609_v16, %v735_v27  ;;  %v171_v19 = vpop.f32.mrf.mxu0  ;;  %v419_v24 = vpop.f32.mrf.mxu1 }
  0xe6   :  { %319 = vst.msk [vmem:[%s947_s7 + $0x24] sm:$0xf] %vm309_vm2, %v549_v12  ;;  %v554_v20 = vpack.c.bf16 %v243_v13, %v243_v13  ;;  %v241_v21 = vmax.f32 %v225_v14, 0.0  ;;  %v228_v22 = vadd.f32 %v740_v29, %v205_v15  ;;  %v203_v23 = vmul.f32 %v730_v26, %v171_v19 }
  0xe7   :  { %490 = vst.msk [vmem:[%s946_s8 + $0x60] sm:$0xff] %vm477_vm1, %v473_v17  ;;  %v476_v25 = vadd.f32 %v746_v32, %v453_v18  ;;  %v451_v28 = vmul.f32 %v735_v27, %v419_v24 }
  0xe8   :  { %324 = vst.msk [vmem:[%s947_s7 + $0x38] sm:$0xf] %vm309_vm2, %v554_v20  ;;  %v552_v30 = vpack.c.bf16 %v241_v21, %v241_v21  ;;  %v244_v31 = vmax.f32 %v228_v22, 0.0  ;;  %v226_v33 = vadd.f32 %v740_v29, %v203_v23 }
  0xe9   :  { %493 = vst.msk [vmem:[%s946_s8 + $0x78] sm:$0xff] %vm477_vm1, %v476_v25  ;;  %v474_v26 = vadd.f32 %v746_v32, %v451_v28 }
  0xea   :  { %322 = vst.msk [vmem:[%s947_s7 + $0x30] sm:$0xf] %vm309_vm2, %v552_v30  ;;  %v555_v27 = vpack.c.bf16 %v244_v31, %v244_v31  ;;  %v242_v34 = vmax.f32 %v226_v33, 0.0 }
  0xeb   :  { %491 = vst.msk [vmem:[%s946_s8 + $0x68] sm:$0xff] %vm477_vm1, %v474_v26 }
  0xec   :  { %325 = vst.msk [vmem:[%s947_s7 + $0x3c] sm:$0xf] %vm309_vm2, %v555_v27  ;;  %v553_v29 = vpack.c.bf16 %v242_v34, %v242_v34 }
  0xee   :  { %323 = vst.msk [vmem:[%s947_s7 + $0x34] sm:$0xf] %vm309_vm2, %v553_v29 }

</bundles_post_ra>
